<compile_context>
chip_gen: v7x
topology: tpu7x:2x2x1
jax: 0.10.0
libtpu: 0.0.40
codegen_flags: <defaults>
</compile_context>

<pallas_src>
import jax
import jax.numpy as jnp
from jax.experimental import pallas as pl
from jax.experimental.pallas import tpu as pltpu


def _round_up(n, m):
    return ((n + m - 1) // m) * m


# ----------------------------------------------------------------------------
# Fused kernel:
#   grid = (K tiles of the flattened image dim D)
#   every step:   emb_acc += x[:, k-tile] @ w_enc[k-tile, :]      (bf16 MXU)
#   last step:    h    = relu(emb_acc @ w1 + b1)
#                 pred = h @ w2 + b2
#                 loss = masked, example-weighted MSE vs gt (f32)
# ----------------------------------------------------------------------------
def _make_fused_kernel(inv_batch):
    inv_batch = float(inv_batch)

    def kernel(x_ref, wenc_ref, w1_ref, b1_ref, w2_ref, b2_ref, gt_ref,
               pred_ref, loss_ref, emb_acc):
        k = pl.program_id(0)

        @pl.when(k == 0)
        def _():
            emb_acc[...] = jnp.zeros_like(emb_acc)

        emb_acc[...] += jnp.dot(x_ref[...], wenc_ref[...],
                                preferred_element_type=jnp.float32)

        @pl.when(k == pl.num_programs(0) - 1)
        def _():
            emb = emb_acc[...].astype(jnp.bfloat16)
            h = jnp.dot(emb, w1_ref[...],
                        preferred_element_type=jnp.float32) + b1_ref[...]
            h = jnp.maximum(h, 0.0)
            pred = jnp.dot(h.astype(jnp.bfloat16), w2_ref[...],
                           preferred_element_type=jnp.float32) + b2_ref[...]
            pred_ref[...] = pred

            # masked, example-weighted MSE (all f32, matches the PyTorch code)
            gt = gt_ref[...]
            mask = (gt > 0.0).astype(jnp.float32)
            msum = jnp.sum(mask, axis=1, keepdims=True)          # (B_pad, 1)
            # mean over the *real* batch (padded rows have msum == 0)
            mean_msum = jnp.sum(msum) * inv_batch
            w = msum / (mean_msum + 1e-8)                        # (B_pad, 1)
            se = (pred - gt) * (pred - gt)                       # MSE(reduce=False)
            per_ex = jnp.sum(se * mask, axis=1, keepdims=True) / (msum + 1e-8)
            weighted = per_ex * w                                # (B_pad, 1)
            # mean over real batch; padded rows contribute exactly 0
            loss_ref[...] = jnp.sum(weighted, axis=0, keepdims=True) * inv_batch

    return kernel


def quantity_forward_and_loss(x_flat, gt, w_enc, w1, b1, w2, b2, *, tk_max=512):
    """Returns (pred_quantity (B, Q) f32, quantity_loss scalar f32)."""
    B, D = x_flat.shape
    E = w_enc.shape[1]
    H = w1.shape[1]
    Q = w2.shape[1]

    # lane / sublane / MXU friendly padded sizes
    B_pad = _round_up(max(B, 8), 8)
    E_pad = _round_up(E, 128)
    H_pad = _round_up(H, 128)
    Q_pad = _round_up(Q, 128)
    tk = min(tk_max, _round_up(D, 128))
    D_pad = _round_up(D, tk)
    n_k = D_pad // tk

    f32, bf16 = jnp.float32, jnp.bfloat16

    # zero-pad everything; padded rows/cols contribute exactly zero
    xp = jnp.zeros((B_pad, D_pad), bf16).at[:B, :D].set(x_flat.astype(bf16))
    wencp = jnp.zeros((D_pad, E_pad), bf16).at[:D, :E].set(w_enc.astype(bf16))
    w1p = jnp.zeros((E_pad, H_pad), bf16).at[:E, :H].set(w1.astype(bf16))
    b1p = jnp.zeros((1, H_pad), f32).at[:, :H].set(b1.astype(f32))
    w2p = jnp.zeros((H_pad, Q_pad), bf16).at[:H, :Q].set(w2.astype(bf16))
    b2p = jnp.zeros((1, Q_pad), f32).at[:, :Q].set(b2.astype(f32))
    gtp = jnp.zeros((B_pad, Q_pad), f32).at[:B, :Q].set(gt.astype(f32))

    kernel = _make_fused_kernel(1.0 / B)

    cost = pl.CostEstimate(
        flops=2 * B_pad * (D_pad * E_pad + E_pad * H_pad + H_pad * Q_pad),
        transcendentals=0,
        bytes_accessed=(
            2 * (xp.size + wencp.size + w1p.size + w2p.size)          # bf16
            + 4 * (b1p.size + b2p.size + gtp.size + B_pad * Q_pad + 1)  # f32
        ),
    )

    pred_pad, loss = pl.pallas_call(
        kernel,
        out_shape=(
            jax.ShapeDtypeStruct((B_pad, Q_pad), f32),   # pred (lane-dense)
            jax.ShapeDtypeStruct((1, 1), f32),           # loss scalar
        ),
        grid_spec=pltpu.PrefetchScalarGridSpec(
            num_scalar_prefetch=0,
            grid=(n_k,),
            in_specs=[
                pl.BlockSpec((B_pad, tk), lambda k: (0, k)),      # x (K-tiled)
                pl.BlockSpec((tk, E_pad), lambda k: (k, 0)),      # w_enc (K-tiled)
                pl.BlockSpec((E_pad, H_pad), lambda k: (0, 0)),   # w1
                pl.BlockSpec((1, H_pad), lambda k: (0, 0)),       # b1
                pl.BlockSpec((H_pad, Q_pad), lambda k: (0, 0)),   # w2
                pl.BlockSpec((1, Q_pad), lambda k: (0, 0)),       # b2
                pl.BlockSpec((B_pad, Q_pad), lambda k: (0, 0)),   # gt
            ],
            out_specs=(
                pl.BlockSpec((B_pad, Q_pad), lambda k: (0, 0)),
                pl.BlockSpec((1, 1), lambda k: (0, 0)),
            ),
            scratch_shapes=[pltpu.VMEM((B_pad, E_pad), jnp.float32)],
        ),
        compiler_params=pltpu.CompilerParams(
            dimension_semantics=("arbitrary",),        # K is a reduction axis
            vmem_limit_bytes=32 * 1024 * 1024,         # safe on v5e/v6e/v7x
        ),
        cost_estimate=cost,
    )(xp, wencp, w1p, b1p, w2p, b2p, gtp)

    return pred_pad[:B, :Q], loss[0, 0]


# ----------------------------------------------------------------------------
# Module wrapper (forward pass of Inverse_Quantity, non-sample path)
# ----------------------------------------------------------------------------
def inverse_quantity_forward(img_inputs, ingr_gt, quantity_gt, params,
                             val=False):
    B = img_inputs.shape[0]
    # image encoder input: NCHW flattened row-major (same as torch .view(B,-1))
    x_flat = img_inputs.reshape(B, -1).astype(jnp.float32)

    pred_quantity, q_loss = quantity_forward_and_loss(
        x_flat, quantity_gt.astype(jnp.float32),
        params["w_enc"], params["w1"], params["b1"],
        params["w2"], params["b2"],
    )

    # TODO(synk): external inverse_model losses not reproducible in isolation.
    zero = jnp.zeros((), jnp.float32)
    losses = {
        "ingr_loss": zero,
        "eos_loss": zero,
        "card_penalty": zero,
        "quantity_loss": q_loss,
    }
    if val:
        return losses, pred_quantity
    return losses


# ----------------------------------------------------------------------------
def _init_params(key, D, E, H, Q):
    k1, k2, k3 = jax.random.split(key, 3)
    return {
        "w_enc": jax.random.normal(k1, (D, E), jnp.float32) * 0.02,
        "w1": jax.random.normal(k2, (E, H), jnp.float32) * 0.1,
        "b1": jnp.zeros((1, H), jnp.float32),
        "w2": jax.random.normal(k3, (H, Q), jnp.float32) * 0.1,
        "b2": jnp.zeros((1, Q), jnp.float32),
    }


def _reference(img_inputs, quantity_gt, params):
    """Pure-JAX reference using the same bf16-matmul / f32-loss recipe."""
    B = img_inputs.shape[0]
    x = img_inputs.reshape(B, -1).astype(jnp.bfloat16)
    emb = jnp.dot(x, params["w_enc"].astype(jnp.bfloat16),
                  preferred_element_type=jnp.float32)
    h = jnp.maximum(
        jnp.dot(emb.astype(jnp.bfloat16), params["w1"].astype(jnp.bfloat16),
                preferred_element_type=jnp.float32) + params["b1"], 0.0)
    pred = jnp.dot(h.astype(jnp.bfloat16), params["w2"].astype(jnp.bfloat16),
                   preferred_element_type=jnp.float32) + params["b2"]
    gt = quantity_gt.astype(jnp.float32)
    mask = (gt > 0).astype(jnp.float32)
    msum = mask.sum(axis=1)
    w = msum / (msum.mean() + 1e-8)
    l = ((pred - gt) ** 2 * mask).sum(axis=1) / (msum + 1e-8)
    return pred, jnp.mean(l * w)


if __name__ == "__main__":
    key = jax.random.PRNGKey(0)
    k_img, k_gt_q, k_gt_i, k_p = jax.random.split(key, 4)

    B, C, HH, WW = 2, 4, 16, 16           # image inputs, NCHW
    E, Hd, Q = 32, 64, 20                 # embed dim, hidden dim, #ingredients
    D = C * HH * WW

    img_inputs = jax.random.normal(k_img, (B, C, HH, WW), jnp.float32)
    # quantity ground truth: non-negative with zeros (so the mask matters)
    quantity_gt = jnp.maximum(
        jax.random.normal(k_gt_q, (B, Q), jnp.float32), 0.0)
    ingr_gt = jax.random.randint(k_gt_i, (B, Q), 0, 2)

    params = _init_params(k_p, D, E, Hd, Q)

    losses, pred_quantity = inverse_quantity_forward(
        img_inputs, ingr_gt, quantity_gt, params, val=True)
    jax.block_until_ready(pred_quantity)
    jax.block_until_ready(losses["quantity_loss"])

    # sanity check vs pure-JAX reference (same bf16 matmul recipe)
    ref_pred, ref_loss = _reference(img_inputs, quantity_gt, params)
    assert jnp.allclose(pred_quantity, ref_pred, atol=2e-3, rtol=2e-3), (
        float(jnp.max(jnp.abs(pred_quantity - ref_pred))))
    assert jnp.allclose(losses["quantity_loss"], ref_loss,
                        atol=1e-3, rtol=1e-3), (
        float(losses["quantity_loss"]), float(ref_loss))

    print("KERNEL_OK")
</pallas_src>

<mosaic_0001>
module attributes {stable_mosaic.version = 11 : i64} {
  func.func @kernel(%arg0: i32, %arg1: memref<8x512xbf16, #tpu.memory_space<vmem>>, %arg2: memref<512x128xbf16, #tpu.memory_space<vmem>>, %arg3: memref<128x128xbf16, #tpu.memory_space<vmem>>, %arg4: memref<1x128xf32, #tpu.memory_space<vmem>>, %arg5: memref<128x128xbf16, #tpu.memory_space<vmem>>, %arg6: memref<1x128xf32, #tpu.memory_space<vmem>>, %arg7: memref<8x128xf32, #tpu.memory_space<vmem>>, %arg8: memref<8x128xf32, #tpu.memory_space<vmem>>, %arg9: memref<1x1xf32, #tpu.memory_space<vmem>>, %arg10: memref<8x128xf32, #tpu.memory_space<vmem>>) attributes {dimension_semantics = [#tpu.dimension_semantics<arbitrary>], iteration_bounds = array<i64: 2>, scalar_prefetch = 0 : i64, scratch_operands = 1 : i64, tpu.core_type = #tpu.core_type<tc>, window_params = [{transform_indices = @transform_0, window_bounds = array<i64: 8, 512>}, {transform_indices = @transform_1, window_bounds = array<i64: 512, 128>}, {pipeline_mode = #tpu.pipeline_mode<synchronous>, transform_indices = @transform_2, window_bounds = array<i64: 128, 128>}, {pipeline_mode = #tpu.pipeline_mode<synchronous>, transform_indices = @transform_3, window_bounds = array<i64: 1, 128>}, {pipeline_mode = #tpu.pipeline_mode<synchronous>, transform_indices = @transform_4, window_bounds = array<i64: 128, 128>}, {pipeline_mode = #tpu.pipeline_mode<synchronous>, transform_indices = @transform_5, window_bounds = array<i64: 1, 128>}, {pipeline_mode = #tpu.pipeline_mode<synchronous>, transform_indices = @transform_6, window_bounds = array<i64: 8, 128>}, {pipeline_mode = #tpu.pipeline_mode<synchronous>, transform_indices = @transform_7, window_bounds = array<i64: 8, 128>}, {pipeline_mode = #tpu.pipeline_mode<synchronous>, transform_indices = @transform_8, window_bounds = array<i64: 1, 1>}]} {
    %c0_i32 = arith.constant 0 : i32
    %0 = arith.cmpi eq, %arg0, %c0_i32 : i32
    %1 = arith.extui %0 : i1 to i32
    %c0_i32_0 = arith.constant 0 : i32
    %2 = arith.cmpi ne, %1, %c0_i32_0 : i32
    scf.if %2 {
      %cst_9 = arith.constant 0.000000e+00 : f32
      %12 = vector.broadcast %cst_9 : f32 to vector<8x128xf32>
      %c0_10 = arith.constant 0 : index
      %c0_11 = arith.constant 0 : index
      %13 = vector.load %arg10[%c0_10, %c0_11] : memref<8x128xf32, #tpu.memory_space<vmem>>, vector<8x128xf32>
      tpu.vector_store %arg10[%c0_10, %c0_11], %12 {strides = array<i32>} : memref<8x128xf32, #tpu.memory_space<vmem>>, vector<8x128xf32>,
    } else {
    }
    %c0 = arith.constant 0 : index
    %c0_1 = arith.constant 0 : index
    %3 = vector.load %arg10[%c0, %c0_1] : memref<8x128xf32, #tpu.memory_space<vmem>>, vector<8x128xf32>
    %c0_2 = arith.constant 0 : index
    %c0_3 = arith.constant 0 : index
    %4 = vector.load %arg1[%c0_2, %c0_3] : memref<8x512xbf16, #tpu.memory_space<vmem>>, vector<8x512xbf16>
    %c0_4 = arith.constant 0 : index
    %c0_5 = arith.constant 0 : index
    %5 = vector.load %arg2[%c0_4, %c0_5] : memref<512x128xbf16, #tpu.memory_space<vmem>>, vector<512x128xbf16>
    %cst = arith.constant dense<0.000000e+00> : vector<8x128xf32>
    %6 = tpu.matmul %4, %5, %cst {dimension_numbers = #tpu.dot_dimension_numbers<[1], [0], [0], [1], [0, 0, 1, 1], [], []>} : vector<8x512xbf16>, vector<512x128xbf16>, vector<8x128xf32> -> vector<8x128xf32>
    %7 = arith.addf %3, %6 : vector<8x128xf32>
    %c0_6 = arith.constant 0 : index
    %c0_7 = arith.constant 0 : index
    %8 = vector.load %arg10[%c0_6, %c0_7] : memref<8x128xf32, #tpu.memory_space<vmem>>, vector<8x128xf32>
    tpu.vector_store %arg10[%c0_6, %c0_7], %7 {strides = array<i32>} : memref<8x128xf32, #tpu.memory_space<vmem>>, vector<8x128xf32>,
    %c1_i32 = arith.constant 1 : i32
    %9 = arith.cmpi eq, %arg0, %c1_i32 : i32
    %10 = arith.extui %9 : i1 to i32
    %c0_i32_8 = arith.constant 0 : i32
    %11 = arith.cmpi ne, %10, %c0_i32_8 : i32
    scf.if %11 {
      %c0_9 = arith.constant 0 : index
      %c0_10 = arith.constant 0 : index
      %12 = vector.load %arg10[%c0_9, %c0_10] : memref<8x128xf32, #tpu.memory_space<vmem>>, vector<8x128xf32>
      %13 = arith.truncf %12 : vector<8x128xf32> to vector<8x128xbf16>
      %c0_11 = arith.constant 0 : index
      %c0_12 = arith.constant 0 : index
      %14 = vector.load %arg3[%c0_11, %c0_12] : memref<128x128xbf16, #tpu.memory_space<vmem>>, vector<128x128xbf16>
      %cst_13 = arith.constant dense<0.000000e+00> : vector<8x128xf32>
      %15 = tpu.matmul %13, %14, %cst_13 {dimension_numbers = #tpu.dot_dimension_numbers<[1], [0], [0], [1], [0, 0, 1, 1], [], []>} : vector<8x128xbf16>, vector<128x128xbf16>, vector<8x128xf32> -> vector<8x128xf32>
      %c0_14 = arith.constant 0 : index
      %c0_15 = arith.constant 0 : index
      %16 = vector.load %arg4[%c0_14, %c0_15] : memref<1x128xf32, #tpu.memory_space<vmem>>, vector<1x128xf32>
      %17 = vector.broadcast %16 : vector<1x128xf32> to vector<8x128xf32>
      %18 = arith.addf %15, %17 : vector<8x128xf32>
      %cst_16 = arith.constant 0.000000e+00 : f32
      %19 = vector.broadcast %cst_16 : f32 to vector<8x128xf32>
      %20 = arith.maximumf %18, %19 : vector<8x128xf32>
      %21 = arith.truncf %20 : vector<8x128xf32> to vector<8x128xbf16>
      %c0_17 = arith.constant 0 : index
      %c0_18 = arith.constant 0 : index
      %22 = vector.load %arg5[%c0_17, %c0_18] : memref<128x128xbf16, #tpu.memory_space<vmem>>, vector<128x128xbf16>
      %cst_19 = arith.constant dense<0.000000e+00> : vector<8x128xf32>
      %23 = tpu.matmul %21, %22, %cst_19 {dimension_numbers = #tpu.dot_dimension_numbers<[1], [0], [0], [1], [0, 0, 1, 1], [], []>} : vector<8x128xbf16>, vector<128x128xbf16>, vector<8x128xf32> -> vector<8x128xf32>
      %c0_20 = arith.constant 0 : index
      %c0_21 = arith.constant 0 : index
      %24 = vector.load %arg6[%c0_20, %c0_21] : memref<1x128xf32, #tpu.memory_space<vmem>>, vector<1x128xf32>
      %25 = vector.broadcast %24 : vector<1x128xf32> to vector<8x128xf32>
      %26 = arith.addf %23, %25 : vector<8x128xf32>
      %c0_22 = arith.constant 0 : index
      %c0_23 = arith.constant 0 : index
      %27 = vector.load %arg8[%c0_22, %c0_23] : memref<8x128xf32, #tpu.memory_space<vmem>>, vector<8x128xf32>
      tpu.vector_store %arg8[%c0_22, %c0_23], %26 {strides = array<i32>} : memref<8x128xf32, #tpu.memory_space<vmem>>, vector<8x128xf32>,
      %c0_24 = arith.constant 0 : index
      %c0_25 = arith.constant 0 : index
      %28 = vector.load %arg7[%c0_24, %c0_25] : memref<8x128xf32, #tpu.memory_space<vmem>>, vector<8x128xf32>
      %cst_26 = arith.constant 0.000000e+00 : f32
      %29 = vector.broadcast %cst_26 : f32 to vector<8x128xf32>
      %30 = arith.cmpf ogt, %28, %29 : vector<8x128xf32>
      %31 = arith.extui %30 : vector<8x128xi1> to vector<8x128xi32>
      %32 = arith.sitofp %31 : vector<8x128xi32> to vector<8x128xf32>
      %cst_27 = arith.constant dense<0.000000e+00> : vector<8xf32>
      %33 = vector.multi_reduction <add>, %32, %cst_27 [1] : vector<8x128xf32> to vector<8xf32>
      %34 = vector.shape_cast %33 : vector<8xf32> to vector<8x1xf32>
      %35 = vector.shape_cast %34 : vector<8x1xf32> to vector<1x8x1xf32>
      %cst_28 = arith.constant dense<0.000000e+00> : vector<1xf32>
      %36 = vector.multi_reduction <add>, %35, %cst_28 [1, 2] : vector<1x8x1xf32> to vector<1xf32>
      %37 = vector.shape_cast %36 : vector<1xf32> to vector<1x1x1xf32>
      %38 = vector.extract %37[0, 0, 0] : f32 from vector<1x1x1xf32>
      %cst_29 = arith.constant 5.000000e-01 : f32
      %39 = arith.mulf %38, %cst_29 : f32
      %cst_30 = arith.constant 9.99999993E-9 : f32
      %40 = arith.addf %39, %cst_30 : f32
      %41 = vector.broadcast %40 : f32 to vector<8x1xf32>
      %42 = arith.divf %34, %41 : vector<8x1xf32>
      %43 = arith.subf %26, %28 : vector<8x128xf32>
      %44 = arith.subf %26, %28 : vector<8x128xf32>
      %45 = arith.mulf %43, %44 : vector<8x128xf32>
      %46 = arith.mulf %45, %32 : vector<8x128xf32>
      %cst_31 = arith.constant dense<0.000000e+00> : vector<8xf32>
      %47 = vector.multi_reduction <add>, %46, %cst_31 [1] : vector<8x128xf32> to vector<8xf32>
      %48 = vector.shape_cast %47 : vector<8xf32> to vector<8x1xf32>
      %cst_32 = arith.constant 9.99999993E-9 : f32
      %49 = vector.broadcast %cst_32 : f32 to vector<8x1xf32>
      %50 = arith.addf %34, %49 : vector<8x1xf32>
      %51 = arith.divf %48, %50 : vector<8x1xf32>
      %52 = arith.mulf %51, %42 : vector<8x1xf32>
      %cst_33 = arith.constant dense<0.000000e+00> : vector<1xf32>
      %53 = vector.multi_reduction <add>, %52, %cst_33 [0] : vector<8x1xf32> to vector<1xf32>
      %54 = vector.shape_cast %53 : vector<1xf32> to vector<1x1xf32>
      %cst_34 = arith.constant 5.000000e-01 : f32
      %55 = vector.broadcast %cst_34 : f32 to vector<1x1xf32>
      %56 = arith.mulf %54, %55 : vector<1x1xf32>
      %c0_35 = arith.constant 0 : index
      %c0_36 = arith.constant 0 : index
      %57 = vector.load %arg9[%c0_35, %c0_36] : memref<1x1xf32, #tpu.memory_space<vmem>>, vector<1x1xf32>
      tpu.vector_store %arg9[%c0_35, %c0_36], %56 {strides = array<i32>} : memref<1x1xf32, #tpu.memory_space<vmem>>, vector<1x1xf32>,
    } else {
    }
    return
  }
  func.func @transform_0(%arg0: i32) -> (i32, i32) {
    %c0_i32 = arith.constant 0 : i32
    %c0_i32_0 = arith.constant 0 : i32
    return %c0_i32, %arg0 : i32, i32
  }
  func.func @transform_1(%arg0: i32) -> (i32, i32) {
    %c0_i32 = arith.constant 0 : i32
    %c0_i32_0 = arith.constant 0 : i32
    return %arg0, %c0_i32 : i32, i32
  }
  func.func @transform_2(%arg0: i32) -> (i32, i32) {
    %c0_i32 = arith.constant 0 : i32
    %c0_i32_0 = arith.constant 0 : i32
    %c0_i32_1 = arith.constant 0 : i32
    return %c0_i32, %c0_i32_0 : i32, i32
  }
  func.func @transform_3(%arg0: i32) -> (i32, i32) {
    %c0_i32 = arith.constant 0 : i32
    %c0_i32_0 = arith.constant 0 : i32
    %c0_i32_1 = arith.constant 0 : i32
    return %c0_i32, %c0_i32_0 : i32, i32
  }
  func.func @transform_4(%arg0: i32) -> (i32, i32) {
    %c0_i32 = arith.constant 0 : i32
    %c0_i32_0 = arith.constant 0 : i32
    %c0_i32_1 = arith.constant 0 : i32
    return %c0_i32, %c0_i32_0 : i32, i32
  }
  func.func @transform_5(%arg0: i32) -> (i32, i32) {
    %c0_i32 = arith.constant 0 : i32
    %c0_i32_0 = arith.constant 0 : i32
    %c0_i32_1 = arith.constant 0 : i32
    return %c0_i32, %c0_i32_0 : i32, i32
  }
  func.func @transform_6(%arg0: i32) -> (i32, i32) {
    %c0_i32 = arith.constant 0 : i32
    %c0_i32_0 = arith.constant 0 : i32
    %c0_i32_1 = arith.constant 0 : i32
    return %c0_i32, %c0_i32_0 : i32, i32
  }
  func.func @transform_7(%arg0: i32) -> (i32, i32) {
    %c0_i32 = arith.constant 0 : i32
    %c0_i32_0 = arith.constant 0 : i32
    %c0_i32_1 = arith.constant 0 : i32
    return %c0_i32, %c0_i32_0 : i32, i32
  }
  func.func @transform_8(%arg0: i32) -> (i32, i32) {
    %c0_i32 = arith.constant 0 : i32
    %c0_i32_0 = arith.constant 0 : i32
    %c0_i32_1 = arith.constant 0 : i32
    return %c0_i32, %c0_i32_0 : i32, i32
  }
}

</mosaic_0001>

<bundles_post_ra>
// kernel: tpu_custom_call.1
= control target key start
LH: loop header
LB: loop body
LE: loop exit
PB: predicated region body
PF: predicated region fallthrough
CT: control target
= control target key end

     0   :  { %s2069_s0 = inlined_call_operand.hbm [shape: bf16[8,1024], index: 0, kind: input, shape index: {}]   ;;  %s2070_s1 = inlined_call_operand.hbm [shape: bf16[1024,128], index: 1, kind: input, shape index: {}]   ;;  %s2071_s2 = inlined_call_operand.hbm [shape: bf16[128,128], index: 2, kind: input, shape index: {}]   ;;  %s2072_s3 = inlined_call_operand.vmem [shape: f32[1,128], index: 3, kind: input, shape index: {}]   ;;  %s2073_s4 = inlined_call_operand.hbm [shape: bf16[128,128], index: 4, kind: input, shape index: {}]   ;;  %s2074_s5 = inlined_call_operand.vmem [shape: f32[1,128], index: 5, kind: input, shape index: {}]   ;;  %s2075_s6 = inlined_call_operand.vmem [shape: f32[8,128], index: 6, kind: input, shape index: {}]   ;;  %s2076_s7 = inlined_call_operand.hbm [shape: f32[8,128], index: 7, kind: output, shape index: {0}]   ;;  %s2077_s8 = inlined_call_operand.hbm [shape: f32[1,1], index: 8, kind: output, shape index: {1}]  }
   0x1   :  { %2083 = sst [smem:[#allocation20_spill]] %s2069_s0 }
   0x2   :  { %14 = vsyncpa [#allocation4], 0 }
   0x3   :  { %16 = vsyncpa [#allocation4 + $0x1], 0 }
   0x4   :  { %17 = vsyncpa [#allocation7], 0 }
   0x5   :  { %19 = vsyncpa [#allocation7 + $0x1], 0 }
   0x6   :  { %20 = vsyncpa [#allocation10], 0 }
   0x7   :  { %21 = vsyncpa [#allocation5], 0 }
   0x8   :  { %22 = vsyncpa [#allocation13], 0  ;;  %s1738_s27 = smov 0   ;;  %s1740_s28 = smov 0  }
   0x9   :  { %s1742_s29 = smov 0   ;;  %s1744_s30 = smov 0  }
   0xa LB: > { %s1757_s9 = sadd.s32 4294967295, %s1680_s30   ;;  %p48_p0 = scmp.ne.s32.totalorder %s1672_s28, %s1668_s27  ;;  %s1680_s30 = sphi %s1744_s30, %s2102_s30   ;;  %s1676_s29 = sphi %s1742_s29, %s2101_s29   ;;  %s1672_s28 = sphi %s1740_s28, %s2100_s28   ;;  %s1668_s27 = sphi %s1738_s27, %s2099_s27  }
   0xb   : > { %p2078_p1 = scmp.eq.s32.totalorder %s1757_s9, 0  ;;  %p1134_p2 = scmp.ge.s32.totalorder %s1680_s30, 1 }
   0xc   : > { %p232_p3 = scmp.lt.s32.totalorder %s1680_s30, 3  ;;  %s1682_s12 = smov [#allocation8]  }
   0xd   : > { %p1766_p5 = por %p2078_p1, %p48_p0  ;;  %s244_s13 = sshll.u32 %s1682_s12, 4  ;;  %s245_s13 = int_to_ptr.vmem [resolvable:$true] %s244_s13 }
   0xe   : > { %p1770_p6 = pnand %p1134_p2, %p232_p3  ;;  %s1683_s15 = smov [#allocation9]  }
   0xf   : > { %s2084_s10 = scalar_select %p1766_p5, 1, 0 }
  0x10   : > { %s2085_s11 = scalar_select %p1770_p6, 1, 0 }
  0x11   : > { %p1338_p7 = pneg %p1770_p6  ;;  %s260_s16 = sshll.u32 %s1683_s15, 4  ;;  %s1782_s16 = int_to_ptr.vmem [resolvable:$true] %s260_s16 }
  0x12   : > { %s1458_s19 = scalar_lea.hbm %s2071_s2, 1024 }
  0x13   : > { %p1778_p8 = pnand %p1338_p7, %p2078_p1  ;;  %p1459_p9 = scmp.ne.s32.totalorder %s2071_s2, %s1458_s19 }
  0x14   : > { %p1465_p13 = scmp.lt.u32.totalorder %s1458_s19, %s2071_s2 }
  0x15   : > { %p1460_p10 = pneg %p1778_p8 }
  0x17   : > { %p1461_p11 = pnand %p1460_p10, %p1459_p9 }
  0x19   : > { %p1462_p12 = pneg %p1461_p11 }
  0x1b   : > { %p1467_p0 = pnand %p1465_p13, %p1462_p12 }
  0x1d   : > { %1470 = shalt.err (!%p1467_p0)
}
  0x1e   : > { %s1471_s24 = scalar_lea.vmem %s245_s13, 1024  ;;  %p1479_p4 = scmp.lt.s32.totalorder %s245_s13, %s245_s13 }
  0x1f   : > { %p1472_p2 = scmp.ne.s32.totalorder %s245_s13, %s1471_s24  ;;  %p1480_p1 = scmp.lt.s32.totalorder %s1471_s24, %s1471_s24 }
  0x21   : > { %p1474_p3 = pnand %p1472_p2, %p1460_p10  ;;  %p1481_p5 = por %p1480_p1, %p1479_p4 }
  0x23   : > { %p1475_p7 = pneg %p1474_p3 }
  0x25   : > { %p1482_p6 = pnand %p1481_p5, %p1475_p7 }
  0x27   : > { %1485 = shalt.err (!%p1482_p6)
}
  0x28   : > { %s2081_s25 = smov 64   ;;  %s2082_s26 = smov 4  }
  0x29   : > { %1341 = dma.hbm_to_vmem [thread:$0]  (!%p1778_p8), %s2071_s2, 1024, %s245_s13, [#allocation7], %s2081_s25, %s2081_s25, %s2082_s26  }
  0x2a   : > { %s1486_s18 = scalar_lea.hbm %s2073_s4, 1024 }
  0x2b   : > { %p1487_p1 = scmp.ne.s32.totalorder %s2073_s4, %s1486_s18  ;;  %p1493_p6 = scmp.lt.u32.totalorder %s1486_s18, %s2073_s4 }
  0x2d   : > { %p1489_p4 = pnand %p1487_p1, %p1460_p10 }
  0x2f   : > { %p1490_p5 = pneg %p1489_p4 }
  0x31   : > { %p1495_p9 = pnand %p1493_p6, %p1490_p5 }
  0x33   : > { %1498 = shalt.err (!%p1495_p9)
}
  0x34   : > { %s1499_s13 = scalar_lea.vmem %s1782_s16, 1024  ;;  %p1507_p0 = scmp.lt.s32.totalorder %s1782_s16, %s1782_s16 }
  0x35   : > { %p1500_p11 = scmp.ne.s32.totalorder %s1782_s16, %s1499_s13  ;;  %p1508_p2 = scmp.lt.s32.totalorder %s1499_s13, %s1499_s13 }
  0x37   : > { %p1502_p12 = pnand %p1500_p11, %p1460_p10  ;;  %p1509_p3 = por %p1508_p2, %p1507_p0 }
  0x39   : > { %p1503_p13 = pneg %p1502_p12 }
  0x3b   : > { %p1510_p7 = pnand %p1509_p3, %p1503_p13 }
  0x3d   : > { %1513 = shalt.err (!%p1510_p7)
}
  0x3e   : > { %1344 = dma.hbm_to_vmem [thread:$0]  (!%p1778_p8), %s2073_s4, 1024, %s1782_s16, [#allocation10], %s2081_s25, %s2081_s25, %s2082_s26  }
  0x3f   : > { %s1838_s27 = sadd.s32 1, %s1680_s30   ;;  %s35_s14 = sadd.s32 1, %s1676_s29 }
  0x40   : > { %s32_s12 = ssub.s32 %s1680_s30, %s1838_s27  ;;  %p42_p10 = scmp.ne.s32.totalorder %s1676_s29, %s1672_s28 }
  0x41   : > { %p33_p1 = scmp.eq.s32.totalorder %s32_s12, 0  ;;  %p43_p4 = scmp.eq.s32.totalorder %s1680_s30, 0 }
  0x42   : > { %p1354_p5 = scmp.lt.s32.totalorder %s1680_s30, 2  ;;  %s1848_s15 = sand.u32 1, %s1676_s29  }
  0x43   : > { %s1851_s17 = scalar_select %p33_p1, %s1676_s29, %s35_s14  }
  0x44   : > { %p44_p6 = por %p43_p4, %p42_p10  ;;  %s1138_s18 = sshll.u32 %s1848_s15, 4 }
  0x45   : > { %s1212_s19 = sshll.u32 %s1680_s30, 8  ;;  %s2087_s0 = sld [smem:[#allocation20_spill]] }
  0x46   : > { %s284_s22 = scalar_lea.vmem [#allocation3], %s1138_s18  ;;  %p1860_p8 = pnand %p1354_p5, %p44_p6 }
  0x47   : > { %s292_s13 = sshll.u32 %s284_s22, 4  ;;  %s1141_s24 = sshll.u32 %s1848_s15, 8  ;;  %s1864_s13 = int_to_ptr.vmem [resolvable:$true] %s292_s13 }
  0x48   : > { %s281_s14 = scalar_lea.sflag [#allocation4], %s1848_s15  ;;  %p1516_p11 = pneg %p1860_p8 }
  0x4b   : > { %s1858_s21 = scalar_lea.hbm %s2087_s0, %s1212_s19  ;;  %s1519_s16 = scalar_lea.hbm %s2087_s0, 512 }
  0x4c   : > { %s1514_s12 = scalar_lea.hbm %s1858_s21, 256  ;;  %p1520_p0 = scmp.lt.u32.totalorder %s1858_s21, %s2087_s0 }
  0x4d   : > { %p1515_p9 = scmp.ne.s32.totalorder %s1858_s21, %s1514_s12  ;;  %p1521_p2 = scmp.lt.u32.totalorder %s1519_s16, %s1514_s12 }
  0x4e   : > { %p1523_p7 = scmp.lt.u32.totalorder %s1514_s12, %s1858_s21 }
  0x4f   : > { %p1517_p12 = pnand %p1516_p11, %p1515_p9  ;;  %p1522_p3 = por %p1521_p2, %p1520_p0 }
  0x51   : > { %p1518_p13 = pneg %p1517_p12  ;;  %p1524_p10 = por %p1523_p7, %p1522_p3 }
  0x53   : > { %p1525_p1 = pnand %p1524_p10, %p1518_p13 }
  0x55   : > { %1528 = shalt.err (!%p1525_p1)
}
  0x56   : > { %s1529_s25 = scalar_lea.vmem %s1864_s13, 256  ;;  %s1686_s18 = smov [#allocation3]  }
  0x57   : > { %p1530_p4 = scmp.ne.s32.totalorder %s1864_s13, %s1529_s25  ;;  %s1534_s19 = sshll.u32 %s1686_s18, 4  ;;  %s1535_s19 = int_to_ptr.vmem [resolvable:$false] %s1534_s19 }
  0x58   : > { %s1536_s20 = scalar_lea.vmem %s1535_s19, 512  ;;  %p1537_p9 = scmp.lt.s32.totalorder %s1864_s13, %s1535_s19 }
  0x59   : > { %p1532_p5 = pnand %p1530_p4, %p1516_p11  ;;  %p1538_p12 = scmp.lt.s32.totalorder %s1536_s20, %s1529_s25 }
  0x5b   : > { %p1533_p6 = pneg %p1532_p5  ;;  %p1539_p0 = por %p1538_p12, %p1537_p9 }
  0x5d   : > { %p1540_p2 = pnand %p1539_p0, %p1533_p6 }
  0x5f   : > { %1543 = shalt.err (!%p1540_p2)
}
  0x60   : > { %1348 = dma.hbm_to_vmem [thread:$0]  (!%p1860_p8), %s1858_s21, 256, %s1864_s13, %s281_s14  }
  0x61   : > { %s303_s12 = scalar_lea.vmem [#allocation6], %s1141_s24  ;;  %s299_s22 = sand.u32 1, %s1680_s30  }
  0x62   : > { %s310_s16 = sshll.u32 %s303_s12, 4  ;;  %s1213_s18 = sshll.u32 %s1680_s30, 12  ;;  %s1896_s16 = int_to_ptr.vmem [resolvable:$true] %s310_s16 }
  0x63   : > { %s1902_s20 = scalar_lea.hbm %s2070_s1, %s1213_s18  ;;  %s1904_s26 = scalar_lea.sflag [#allocation7], %s299_s22 }
  0x64   : > { %s1544_s0 = scalar_lea.hbm %s1902_s20, 4096  ;;  %s1549_s30 = scalar_lea.hbm %s2070_s1, 8192 }
  0x65   : > { %p1545_p13 = scmp.ne.s32.totalorder %s1902_s20, %s1544_s0  ;;  %p1550_p10 = scmp.lt.u32.totalorder %s1902_s20, %s2070_s1 }
  0x66   : > { %p1551_p1 = scmp.lt.u32.totalorder %s1549_s30, %s1544_s0  ;;  %p1553_p5 = scmp.lt.u32.totalorder %s1544_s0, %s1902_s20 }
  0x67   : > { %p1547_p3 = pnand %p1545_p13, %p1516_p11 }
  0x68   : > { %p1552_p4 = por %p1551_p1, %p1550_p10 }
  0x69   : > { %p1548_p7 = pneg %p1547_p3 }
  0x6a   : > { %p1554_p6 = por %p1553_p5, %p1552_p4 }
  0x6c   : > { %p1555_p9 = pnand %p1554_p6, %p1548_p7 }
  0x6e   : > { %1558 = shalt.err (!%p1555_p9)
}
  0x6f   : > { %s1559_s14 = scalar_lea.vmem %s1896_s16, 4096  ;;  %s1687_s12 = smov [#allocation6]  }
  0x70   : > { %p1560_p12 = scmp.ne.s32.totalorder %s1896_s16, %s1559_s14  ;;  %s1564_s22 = sshll.u32 %s1687_s12, 4  ;;  %s1565_s22 = int_to_ptr.vmem [resolvable:$false] %s1564_s22 }
  0x71   : > { %s1566_s18 = scalar_lea.vmem %s1565_s22, 8192  ;;  %p1567_p13 = scmp.lt.s32.totalorder %s1896_s16, %s1565_s22 }
  0x72   : > { %p1562_p0 = pnand %p1560_p12, %p1516_p11  ;;  %p1568_p3 = scmp.lt.s32.totalorder %s1566_s18, %s1559_s14 }
  0x74   : > { %p1563_p2 = pneg %p1562_p0  ;;  %p1569_p10 = por %p1568_p3, %p1567_p13 }
  0x76   : > { %p1570_p1 = pnand %p1569_p10, %p1563_p2 }
  0x78   : > { %1573 = shalt.err (!%p1570_p1)
}
  0x79   : > { %s2089_s0 = smov 4   ;;  %s2090_s25 = smov 64  }
  0x7a   : > { %1351 = dma.hbm_to_vmem [thread:$0]  (!%p1860_p8), %s1902_s20, 4096, %s1896_s16, %s1904_s26, %s2090_s25, %s2090_s25, %s2089_s0  }
  0x7b   : > { %p2091_p11 = scmp.ne.s32.totalorder %s2085_s11, 0 }
  0x7c   : > { %s324_s19 = sand.u32 (!%p2091_p11), 1, %s1672_s28   ;;  %p2092_p7 = scmp.ne.s32.totalorder (!%p2091_p11), %s2084_s10, 0 }
  0x7d   : > { %322 = sbr.rel (%p2091_p11) target bundleno = 1063 (0x427), region = 48  ;;  %s1145_s15 = sshll.u32 (!%p2091_p11), %s324_s19, 4 }
  0x7e   : > { %s325_s21 = scalar_lea.sflag (!%p2091_p11), [#allocation4], %s324_s19  ;;  %s1936_s30 = scalar_lea.vmem (!%p2091_p11), [#allocation3], %s1145_s15 }
  0x84   : > { %1643 = dma.done.wait (%p2092_p7), %s325_s21, 256  }
  0x85   : > { %1645 = vsyncadd (%p2092_p7), %s325_s21, 4294967040  ;;  %s333_s23 = sand.u32 1, %s1757_s9   ;;  %s1146_s13 = sshll.u32 %s324_s19, 8 }
  0x86   : > { %s334_s26 = scalar_lea.sflag [#allocation7], %s333_s23  ;;  %s1943_s16 = scalar_lea.vmem [#allocation6], %s1146_s13 }
  0x87   : > { %1647 = dma.done.wait (%p2092_p7), %s334_s26, 4096  }
  0x88   : > { %1649 = vsyncadd (%p2092_p7), %s334_s26, 4294963200  ;;  %p2093_p8 = scmp.eq.s32.totalorder %s1757_s9, 0 }
  0x8a   : > { %1651 = dma.done.wait (%p2093_p8), [#allocation7], 1024   ;;  %p2094_p4 = pmov %p2093_p8 }
  0x8c   : > { %1653 = vsyncadd (%p2094_p4), [#allocation7], 4294966272  ;;  %p2095_p5 = pmov %p2094_p4 }
  0x8d   : > { %p2096_p6 = pmov %p2094_p4 }
  0x8e   : > { %1655 = dma.done.wait (%p2095_p5), [#allocation10], 1024  }
  0x8f   : > { %1657 = vsyncadd (%p2096_p6), [#allocation10], 4294966272  ;;  %p2097_p9 = scmp.ne.s32.totalorder %s1757_s9, 0 }
  0x90   : > { %v1688_v0 = vmov (!%p2097_p9), 0.0  }
  0x91   : > { %384 = sbr.rel (%p2097_p9) target bundleno = 152 (0x98), region = 68  ;;  %385 = vst [vmem:[#allocation2] sm:$0xff] (!%p2097_p9), %v1688_v0 }
  0x98 PF: > { %v1402_v1 = vld [vmem:[%s1943_s16 + $0x40] sm:$0xff]   ;;  %v1406_v5 = vld [vmem:[%s1943_s16 + $0x48] sm:$0xff]   ;;  %v1410_v9 = vld [vmem:[%s1943_s16 + $0x50] sm:$0xff]   ;;  %p1186_p12 = scmp.ne.s32.totalorder %s1757_s9, 1 }
  0x99   : > { %v1403_v2 = vld [vmem:[%s1943_s16 + $0xc0] sm:$0xff]   ;;  %1214 = vmatprep.subr.bf16.mxu0 %v1402_v1  ;;  %v1407_v6 = vld [vmem:[%s1943_s16 + $0xc8] sm:$0xff]   ;;  %v1411_v10 = vld [vmem:[%s1943_s16 + $0xd0] sm:$0xff]   ;;  %v1689_v53 = vmov (!%p1186_p12), 0.0   ;;  %vm1690_vm0 = vmmov (!%p1186_p12), 0   ;;  %vm978_vm2 = vcmask (!%p1186_p12), 7168  }
  0x9a   : > { %v1404_v3 = vld [vmem:[%s1943_s16] sm:$0xff]   ;;  %1236 = vmatprep.subr.bf16.mxu1 %v1403_v2  ;;  %v1408_v7 = vld [vmem:[%s1943_s16 + $0x8] sm:$0xff]   ;;  %v1412_v11 = vld [vmem:[%s1943_s16 + $0x10] sm:$0xff]   ;;  %vm1010_vm3 = vcmask (!%p1186_p12), 0  }
  0x9b   : > { %v1405_v4 = vld [vmem:[%s1943_s16 + $0x80] sm:$0xff]   ;;  %1215 = vmatpush3.bf16.msra.mxu0 %v1404_v3  ;;  %v1409_v8 = vld [vmem:[%s1943_s16 + $0x88] sm:$0xff]   ;;  %v1413_v12 = vld [vmem:[%s1943_s16 + $0x90] sm:$0xff]  }
  0x9c   : > { %1237 = vmatpush3.bf16.msra.mxu1 %v1405_v4  ;;  %1216 = vmatprep.subr.bf16.mxu0 %v1406_v5  ;;  %v1414_v13 = vld [vmem:[%s1943_s16 + $0x58] sm:$0xff]   ;;  %v1418_v17 = vld [vmem:[%s1943_s16 + $0x60] sm:$0xff]   ;;  %v1422_v21 = vld [vmem:[%s1943_s16 + $0x68] sm:$0xff]  }
  0x9d   : > { %1238 = vmatprep.subr.bf16.mxu1 %v1407_v6  ;;  %v1415_v14 = vld [vmem:[%s1943_s16 + $0xd8] sm:$0xff]   ;;  %v1419_v18 = vld [vmem:[%s1943_s16 + $0xe0] sm:$0xff]   ;;  %v1423_v22 = vld [vmem:[%s1943_s16 + $0xe8] sm:$0xff]  }
  0x9e   : > { %v1416_v15 = vld [vmem:[%s1943_s16 + $0x18] sm:$0xff]   ;;  %v1420_v19 = vld [vmem:[%s1943_s16 + $0x20] sm:$0xff]   ;;  %v1424_v23 = vld [vmem:[%s1943_s16 + $0x28] sm:$0xff]  }
  0x9f   : > { %1217 = vmatpush3.bf16.msra.mxu0 %v1408_v7  ;;  %v1417_v16 = vld [vmem:[%s1943_s16 + $0x98] sm:$0xff]   ;;  %v1421_v20 = vld [vmem:[%s1943_s16 + $0xa0] sm:$0xff]   ;;  %v1425_v24 = vld [vmem:[%s1943_s16 + $0xa8] sm:$0xff]  }
  0xa0   : > { %1239 = vmatpush3.bf16.msra.mxu1 %v1409_v8  ;;  %1218 = vmatprep.subr.bf16.mxu0 %v1410_v9  ;;  %v1426_v25 = vld [vmem:[%s1943_s16 + $0x70] sm:$0xff]   ;;  %v1430_v29 = vld [vmem:[%s1943_s16 + $0x78] sm:$0xff]   ;;  %v1438_v52 = vld [vmem:[#allocation8] sm:$0xff] (!%p1186_p12)  }
  0xa1   : > { %1240 = vmatprep.subr.bf16.mxu1 %v1411_v10  ;;  %v1427_v26 = vld [vmem:[%s1943_s16 + $0xf0] sm:$0xff]   ;;  %v1431_v30 = vld [vmem:[%s1943_s16 + $0xf8] sm:$0xff]   ;;  %v1439_v54 = vld [vmem:[#allocation8 + $0x8] sm:$0xff] (!%p1186_p12)  }
  0xa2   : > { %v1428_v27 = vld [vmem:[%s1943_s16 + $0x30] sm:$0xff]   ;;  %v1432_v31 = vld [vmem:[%s1943_s16 + $0x38] sm:$0xff]   ;;  %v1442_v59 = vld [vmem:[#allocation8 + $0x20] sm:$0xff] (!%p1186_p12)  }
  0xa3   : > { %1219 = vmatpush3.bf16.msra.mxu0 %v1412_v11  ;;  %v1429_v28 = vld [vmem:[%s1943_s16 + $0xb0] sm:$0xff]   ;;  %v1433_v32 = vld [vmem:[%s1943_s16 + $0xb8] sm:$0xff]   ;;  %v1443_v60 = vld [vmem:[#allocation8 + $0x28] sm:$0xff] (!%p1186_p12)  }
  0xa4   : > { %1241 = vmatpush3.bf16.msra.mxu1 %v1413_v12  ;;  %1220 = vmatprep.subr.bf16.mxu0 %v1414_v13  ;;  %v387_v33 = vld [vmem:[%s1936_s30] sm:$0xff]  ;;  %v388_v34 = vld [vmem:[%s1936_s30 + $0x8] sm:$0xff] }
  0xa5   : > { %1242 = vmatprep.subr.bf16.mxu1 %v1415_v14  ;;  %v1150_v35 = vcombine.low %v387_v33, %v387_v33  ;;  %v1151_v36 = vcombine.high %v387_v33, %v387_v33  ;;  %v1152_v37 = vcombine.low %v388_v34, %v388_v34  ;;  %v1153_v38 = vcombine.high %v388_v34, %v388_v34  ;;  %v386_v47 = vld [vmem:[#allocation2] sm:$0xff]  ;;  %v1440_v55 = vld [vmem:[#allocation8 + $0x10] sm:$0xff] (!%p1186_p12)   ;;  %v1446_v0 = vld [vmem:[#allocation9] sm:$0xff] (!%p1186_p12)  }
  0xa6   : > { %v1997_v56 = vld [vmem:[%s2075_s6] sm:$0xff] (!%p1186_p12)  ;;  %v1444_v61 = vld [vmem:[#allocation8 + $0x30] sm:$0xff] (!%p1186_p12)   ;;  %v1447_v1 = vld [vmem:[#allocation9 + $0x8] sm:$0xff] (!%p1186_p12)  }
  0xa7   : > { %1221 = vmatpush3.bf16.msra.mxu0 %v1416_v15  ;;  %691 = vmatprep.mubr.bf16.mxu0 %v1151_v36  ;;  %vm973_vm1 = vcmp.gt.f32.partialorder (!%p1186_p12), %v1997_v56, 0.0  ;;  %v1441_v57 = vld [vmem:[#allocation8 + $0x18] sm:$0xff] (!%p1186_p12)   ;;  %v1448_v3 = vld [vmem:[#allocation9 + $0x10] sm:$0xff] (!%p1186_p12)   ;;  %v1450_v5 = vld [vmem:[#allocation9 + $0x20] sm:$0xff] (!%p1186_p12)  }
  0xa8   : > { %1243 = vmatpush3.bf16.msra.mxu1 %v1417_v16  ;;  %1222 = vmatprep.subr.bf16.mxu0 %v1418_v17  ;;  %v2000_v58 = vsel (!%p1186_p12), %vm973_vm1, 1.0, %v1689_v53  ;;  %v1445_v62 = vld [vmem:[#allocation8 + $0x38] sm:$0xff] (!%p1186_p12)   ;;  %v1451_v6 = vld [vmem:[#allocation9 + $0x28] sm:$0xff] (!%p1186_p12)   ;;  %v1452_v7 = vld [vmem:[#allocation9 + $0x30] sm:$0xff] (!%p1186_p12)  }
  0xa9   : > { %1244 = vmatprep.subr.bf16.mxu1 %v1419_v18  ;;  %731 = vmatprep.mubr.bf16.mxu1 %v1153_v38  ;;  %v1449_v4 = vld [vmem:[#allocation9 + $0x18] sm:$0xff] (!%p1186_p12)  }
  0xaa   : > { %976 = vadd.xlane.f32.xlu0 (!%p1186_p12), %v2000_v58  ;;  %v1453_v8 = vld [vmem:[#allocation9 + $0x38] sm:$0xff] (!%p1186_p12)  }
  0xab   : > { %1223 = vmatpush3.bf16.msra.mxu0 %v1420_v19  ;;  %v1187_v11 = vld [vmem:[%s2072_s3] ss:$0 sm:$0xff] (!%p1186_p12) }
  0xac   : > { %1245 = vmatpush3.bf16.msra.mxu1 %v1421_v20  ;;  %1224 = vmatprep.subr.bf16.mxu0 %v1422_v21 }
  0xad   : > { %1246 = vmatprep.subr.bf16.mxu1 %v1423_v22 }
  0xaf   : > { %1225 = vmatpush3.bf16.msra.mxu0 %v1424_v23 }
  0xb0   : > { %1247 = vmatpush3.bf16.msra.mxu1 %v1425_v24  ;;  %1226 = vmatprep.subr.bf16.mxu0 %v1426_v25 }
  0xb1   : > { %1248 = vmatprep.subr.bf16.mxu1 %v1427_v26  ;;  %v1196_v26 = vld [vmem:[%s2074_s5] ss:$0 sm:$0xff] (!%p1186_p12) }
  0xb3   : > { %1227 = vmatpush3.bf16.msra.mxu0 %v1428_v27 }
  0xb4   : > { %1249 = vmatpush3.bf16.msra.mxu1 %v1429_v28  ;;  %1228 = vmatprep.subr.bf16.mxu0 %v1430_v29 }
  0xb5   : > { %1250 = vmatprep.subr.bf16.mxu1 %v1431_v30 }
  0xb7   : > { %1229 = vmatpush3.bf16.msra.mxu0 %v1432_v31 }
  0xb8   : > { %1251 = vmatpush3.bf16.msra.mxu1 %v1433_v32  ;;  %1276 = vmatprep.subr.bf16.mxu0 (!%p1186_p12), %v1689_v53 }
  0xb9   : > { %1296 = vmatprep.subr.bf16.mxu1 (!%p1186_p12), %v1689_v53 }
  0xba   : > { %692 = vmatmul.mubr.bf16.vlgmr.msra.gmra.mrb[0].mxu0 %v1150_v35 }
  0xbb   : > { %732 = vmatmul.mubr.bf16.vlgmr.msra.gmra.mrb[0].mxu1 %v1152_v37  ;;  %1277 = vmatpush3.bf16.msra.mxu0 (!%p1186_p12), %v1438_v52 }
  0xbc   : > { %1292 = vmatprep.mubr.msk.bf16.mxu0 (!%p1186_p12), %vm1690_vm0, %v1689_v53  ;;  %1278 = vmatprep.subr.bf16.mxu0 (!%p1186_p12), %v1689_v53 }
  0xbd   : > { %1312 = vmatprep.mubr.msk.bf16.mxu1 (!%p1186_p12), %vm1690_vm0, %v1689_v53  ;;  %1297 = vmatpush3.bf16.msra.mxu1 (!%p1186_p12), %v1446_v0 }
  0xbe   : > { %1298 = vmatprep.subr.bf16.mxu1 (!%p1186_p12), %v1689_v53 }
  0xbf   : > { %1279 = vmatpush3.bf16.msra.mxu0 (!%p1186_p12), %v1439_v54 }
  0xc0   : > { %1280 = vmatprep.subr.bf16.mxu0 (!%p1186_p12), %v1689_v53 }
  0xc1   : > { %1299 = vmatpush3.bf16.msra.mxu1 (!%p1186_p12), %v1447_v1 }
  0xc2   : > { %1300 = vmatprep.subr.bf16.mxu1 (!%p1186_p12), %v1689_v53 }
  0xc3   : > { %1281 = vmatpush3.bf16.msra.mxu0 (!%p1186_p12), %v1440_v55 }
  0xc4   : > { %1282 = vmatprep.subr.bf16.mxu0 (!%p1186_p12), %v1689_v53 }
  0xc5   : > { %1301 = vmatpush3.bf16.msra.mxu1 (!%p1186_p12), %v1448_v3 }
  0xc6   : > { %1302 = vmatprep.subr.bf16.mxu1 (!%p1186_p12), %v1689_v53 }
  0xc7   : > { %1283 = vmatpush3.bf16.msra.mxu0 (!%p1186_p12), %v1441_v57 }
  0xc8   : > { %1284 = vmatprep.subr.bf16.mxu0 (!%p1186_p12), %v1689_v53 }
  0xc9   : > { %1303 = vmatpush3.bf16.msra.mxu1 (!%p1186_p12), %v1449_v4 }
  0xca   : > { %1304 = vmatprep.subr.bf16.mxu1 (!%p1186_p12), %v1689_v53 }
  0xcb   : > { %1285 = vmatpush3.bf16.msra.mxu0 (!%p1186_p12), %v1442_v59 }
  0xcc   : > { %1286 = vmatprep.subr.bf16.mxu0 (!%p1186_p12), %v1689_v53 }
  0xcd   : > { %1305 = vmatpush3.bf16.msra.mxu1 (!%p1186_p12), %v1450_v5 }
  0xce   : > { %1306 = vmatprep.subr.bf16.mxu1 (!%p1186_p12), %v1689_v53 }
  0xcf   : > { %1287 = vmatpush3.bf16.msra.mxu0 (!%p1186_p12), %v1443_v60 }
  0xd0   : > { %1288 = vmatprep.subr.bf16.mxu0 (!%p1186_p12), %v1689_v53 }
  0xd1   : > { %1307 = vmatpush3.bf16.msra.mxu1 (!%p1186_p12), %v1451_v6 }
  0xd2   : > { %1308 = vmatprep.subr.bf16.mxu1 (!%p1186_p12), %v1689_v53 }
  0xd3   : > { %1289 = vmatpush3.bf16.msra.mxu0 (!%p1186_p12), %v1444_v61 }
  0xd4   : > { %1290 = vmatprep.subr.bf16.mxu0 (!%p1186_p12), %v1689_v53 }
  0xd5   : > { %1309 = vmatpush3.bf16.msra.mxu1 (!%p1186_p12), %v1452_v7 }
  0xd6   : > { %1310 = vmatprep.subr.bf16.mxu1 (!%p1186_p12), %v1689_v53 }
  0xd7   : > { %1291 = vmatpush3.bf16.msra.mxu0 (!%p1186_p12), %v1445_v62 }
  0xd9   : > { %1311 = vmatpush3.bf16.msra.mxu1 (!%p1186_p12), %v1453_v8 }
 0x137   : > { %v977_v9 = vpop.xlane.xlu0 (!%p1186_p12), %976 }
 0x138   : > { %v979_v10 = vsel (!%p1186_p12), %vm978_vm2, %v977_v9, 0.0  ;;  %v999_v36 = vadd.f32 (!%p1186_p12), 1e-08, %v977_v9 }
 0x139   : > { %980 = vadd.xlane.f32.xlu0 (!%p1186_p12), %v979_v10 }
 0x18d   : > { %v1230_v39 = vpop.f32.mrb[0].mxu0 }
 0x18e   : > { %v1252_v40 = vpop.f32.mrb[0].mxu1  ;;  %v1231_v41 = vpop.f32.mrb[1].mxu0 }
 0x18f   : > { %v1253_v42 = vpop.f32.mrb[1].mxu1  ;;  %v1232_v43 = vadd.f32 %v1231_v41, %v1230_v39  ;;  %v1233_v45 = vpop.f32.mrb[2].mxu0 }
 0x190   : > { %v1254_v44 = vadd.f32 %v1253_v42, %v1252_v40  ;;  %v1255_v46 = vpop.f32.mrb[2].mxu1  ;;  %v1234_v48 = vpop.f32.mrb[3].mxu0  ;;  %744 = sbr.rel (%p1186_p12) target bundleno = 1015 (0x3f7), region = 72 }
 0x191   : > { %v1256_v49 = vpop.f32.mrb[3].mxu1 }
 0x192   : > { %v734_v50 = vadd.f32 %v1254_v44, %v1232_v43 }
 0x194   : > { %v739_v51 = vadd.f32 %v734_v50, %v386_v47 }
 0x196   : > { %740 = vst [vmem:[#allocation2] sm:$0xff] %v739_v51 }
 0x19d   : > { %v745_v63 = vld [vmem:[#allocation2] sm:$0xff] }
 0x19e   : > { %v746_v2 = vpack.c.bf16 %v745_v63, %v745_v63 }
 0x1a0   : > { %1293 = vmatmul.mubr.bf16.vlgmr.msra.gmra.mrb[0].mxu0 %v746_v2 }
 0x1c6   : > { %v981_v19 = vpop.xlane.xlu0 %980 }
 0x1c7   : > { %v982_v20 = vrot.slane %v981_v19, 4 }
 0x1c9   : > { %v983_v21 = vadd.f32 %v982_v20, %v981_v19 }
 0x1cb   : > { %v984_v22 = vrot.slane %v983_v21, 2 }
 0x1cd   : > { %v985_v23 = vadd.f32 %v984_v22, %v983_v21 }
 0x1cf   : > { %v986_v24 = vrot.slane %v985_v23, 1 }
 0x1d1   : > { %v987_v25 = vadd.f32 %v986_v24, %v985_v23 }
 0x1d3   : > { %1316 = vpush %v987_v25 }
 0x204   : > { %s1317_s22 = spop %1316 }
 0x205   : > { %s989_s18 = smul.f32 0.5, %s1317_s22 }
 0x207   : > { %s990_s0 = sadd.f32 1e-08, %s989_s18 }
 0x209   : > { %v991_v35 = vstv %s990_s0 }
 0x20a   : > { %1454 = vrcp.f32 %v991_v35 }
 0x20b   : > { %1456 = vrcp.f32 %v999_v36 }
 0x214   : > { %v1455_v37 = vpop.eup %1454 }
 0x215   : > { %v1457_v38 = vpop.eup %1456  ;;  %v993_v40 = vmul.f32 %v1455_v37, %v977_v9 }
 0x273   : > { %v852_v12 = vpop.f32.mrb[0].mxu0 }
 0x274   : > { %v853_v13 = vadd.f32 %v1187_v11, %v852_v12  ;;  %v1294_v14 = vpop.f32.mrb[1].mxu0 }
 0x275   : > { %v855_v15 = vpop.f32.mrb[2].mxu0 }
 0x276   : > { %v858_v16 = vmax.f32 %v853_v13, 0.0  ;;  %v1295_v17 = vpop.f32.mrb[3].mxu0 }
 0x278   : > { %v859_v18 = vpack.c.bf16 %v858_v16, %v858_v16 }
 0x27a   : > { %1313 = vmatmul.mubr.bf16.vlgmr.msra.gmra.mrb[0].mxu1 %v859_v18 }
 0x34d   : > { %v965_v27 = vpop.f32.mrb[0].mxu1 }
 0x34e   : > { %v966_v28 = vadd.f32 %v1196_v26, %v965_v27  ;;  %v1314_v29 = vpop.f32.mrb[1].mxu1 }
 0x34f   : > { %v968_v30 = vpop.f32.mrb[2].mxu1 }
 0x350   : > { %971 = vst [vmem:[#allocation11] sm:$0xff] %v966_v28  ;;  %v1315_v31 = vpop.f32.mrb[3].mxu1  ;;  %v994_v32 = vsub.f32 %v966_v28, %v1997_v56 }
 0x352   : > { %v995_v33 = vmul.f32 %v994_v32, %v994_v32 }
 0x354   : > { %v996_v34 = vmul.f32 %v2000_v58, %v995_v33 }
 0x356   : > { %997 = vadd.xlane.f32.xlu1 %v996_v34 }
 0x3e3   : > { %v998_v39 = vpop.xlane.xlu1 %997 }
 0x3e4   : > { %v1001_v41 = vmul.f32 %v1457_v38, %v998_v39 }
 0x3e6   : > { %v1002_v42 = vmul.f32 %v1001_v41, %v993_v40 }
 0x3e8   : > { %v1003_v43 = vrot.slane %v1002_v42, 4 }
 0x3ea   : > { %v1004_v44 = vadd.f32 %v1003_v43, %v1002_v42 }
 0x3ec   : > { %v1005_v45 = vrot.slane %v1004_v44, 2 }
 0x3ee   : > { %v1006_v46 = vadd.f32 %v1005_v45, %v1004_v44 }
 0x3f0   : > { %v1007_v47 = vrot.slane %v1006_v46, 1 }
 0x3f2   : > { %v1008_v48 = vadd.f32 %v1007_v47, %v1006_v46 }
 0x3f4   : > { %v1009_v49 = vmul.f32 0.5, %v1008_v48 }
 0x3f6   : > { %1011 = vst.msk [vmem:[#allocation12] sm:$0x1] %vm1010_vm3, %v1009_v49 }
 0x3f7 PF: > { %p1357_p0 = scmp.eq.s32.totalorder %s1757_s9, 1  ;;  %s1691_s25 = smov [#allocation11]  }
 0x3f8   : > { %s1019_s19 = sshll.u32 %s1691_s25, 4  ;;  %s1692_s15 = smov [#allocation12]   ;;  %s1020_s19 = int_to_ptr.vmem [resolvable:$true] %s1019_s19 }
 0x3f9   : > { %s1030_s21 = sshll.u32 %s1692_s15, 4  ;;  %s1574_s30 = scalar_lea.vmem %s1020_s19, 128  ;;  %s1031_s21 = int_to_ptr.vmem [resolvable:$true] %s1030_s21 }
 0x3fa   : > { %p1575_p2 = scmp.ne.s32.totalorder %s1020_s19, %s1574_s30  ;;  %p1581_p10 = scmp.lt.s32.totalorder %s1020_s19, %s1020_s19 }
 0x3fb   : > { %p1582_p1 = scmp.lt.s32.totalorder %s1574_s30, %s1574_s30 }
 0x3fc   : > { %p1576_p13 = pnand %p1575_p2, %p1357_p0 }
 0x3fd   : > { %p1583_p11 = por %p1582_p1, %p1581_p10 }
 0x3fe   : > { %p1577_p3 = pneg %p1576_p13 }
 0x400   : > { %p1584_p7 = pnand %p1583_p11, %p1577_p3 }
 0x402   : > { %1587 = shalt.err (!%p1584_p7)
}
 0x403   : > { %s1588_s26 = scalar_lea.hbm %s2076_s7, 128 }
 0x404   : > { %p1589_p8 = scmp.ne.s32.totalorder %s2076_s7, %s1588_s26  ;;  %p1594_p6 = scmp.lt.u32.totalorder %s1588_s26, %s2076_s7 }
 0x406   : > { %p1590_p4 = pnand %p1589_p8, %p1357_p0 }
 0x408   : > { %p1591_p5 = pneg %p1590_p4 }
 0x40a   : > { %p1596_p9 = pnand %p1594_p6, %p1591_p5 }
 0x40c   : > { %1599 = shalt.err (!%p1596_p9)
}
 0x40d   : > { %1331 = dma.vmem_to_hbm [thread:$0]  (%p1357_p0), %s1020_s19, 128, %s2076_s7, [#allocation5]  }
 0x40e   : > { %s1600_s12 = scalar_lea.vmem %s1031_s21, 16  ;;  %s1606_s22 = scalar_lea.vmem %s1031_s21, 32 }
 0x40f   : > { %p1601_p12 = scmp.ne.s32.totalorder %s1031_s21, %s1600_s12  ;;  %p1607_p3 = scmp.lt.s32.totalorder %s1031_s21, %s1031_s21 }
 0x410   : > { %p1608_p10 = scmp.lt.s32.totalorder %s1606_s22, %s1600_s12 }
 0x411   : > { %p1602_p2 = pnand %p1601_p12, %p1357_p0 }
 0x412   : > { %p1609_p1 = por %p1608_p10, %p1607_p3 }
 0x413   : > { %p1603_p13 = pneg %p1602_p2 }
 0x415   : > { %p1610_p11 = pnand %p1609_p1, %p1603_p13 }
 0x417   : > { %1613 = shalt.err (!%p1610_p11)
}
 0x418   : > { %s1614_s25 = scalar_lea.hbm %s2077_s8, 16 }
 0x419   : > { %p1615_p7 = scmp.ne.s32.totalorder %s2077_s8, %s1614_s25  ;;  %p1620_p5 = scmp.lt.u32.totalorder %s1614_s25, %s2077_s8 }
 0x41b   : > { %p1616_p8 = pnand %p1615_p7, %p1357_p0 }
 0x41d   : > { %p1617_p4 = pneg %p1616_p8 }
 0x41f   : > { %p1622_p6 = pnand %p1620_p5, %p1617_p4 }
 0x421   : > { %1625 = shalt.err (!%p1622_p6)
}
 0x422   : > { %1333 = dma.vmem_to_hbm [thread:$0]  (%p1357_p0), %s1031_s21, 16, %s2077_s8, [#allocation13]  }
 0x423   : > { %1659 = dma.done.wait (%p1357_p0), [#allocation5], 128  }
 0x424   : > { %1661 = vsyncadd (%p1357_p0), [#allocation5], 4294967168 }
 0x425   : > { %1663 = dma.done.wait (%p1357_p0), [#allocation13], 16  }
 0x426   : > { %1665 = vsyncadd (%p1357_p0), [#allocation13], 4294967280 }
 0x427 PF: > { %s2098_s16 = smov %s1838_s27  ;;  %p25_p9 = scmp.ge.s32.totalorder %s1838_s27, 4  }
 0x428   : > { %s2099_s27 = smov %s1672_s28  ;;  %s2100_s28 = smov %s1676_s29 }
 0x429   : > { %s2101_s29 = smov %s1851_s17  ;;  %s2102_s30 = smov %s2098_s16 }
 0x42a   :  { %27 = sbr.rel (!%p25_p9) target bundleno = 10 (0xa), region = 122 }
 0x431   :  { %1047 = vsyncpa [#allocation4], 1 }
 0x432   :  { %1049 = vsyncpa [#allocation4 + $0x1], 1 }
 0x433   :  { %1050 = vsyncpa [#allocation7], 1 }
 0x434   :  { %1052 = vsyncpa [#allocation7 + $0x1], 1 }
 0x435   :  { %1053 = vsyncpa [#allocation10], 1 }
 0x436   :  { %1054 = vsyncpa [#allocation5], 1 }
 0x437   :  { %1056 = vsyncpa [#allocation5 + $0x1], 1 }
 0x438   :  { %1057 = vsyncpa [#allocation13], 1 }

</bundles_post_ra>
